<compile_context>
chip_gen: v5e
topology: v5e:2x2
jax: 0.10.0
libtpu: 0.0.40
codegen_flags: <defaults>
</compile_context>

<pallas_src>
import math

import jax
import jax.numpy as jnp
from jax import lax
from jax.experimental import pallas as pl
from jax.experimental.pallas import tpu as pltpu


# ---------------------------------------------------------------------------
# Tile-size helper: largest preferred divisor, else the full extent.
# ---------------------------------------------------------------------------
def _pick_tile(n, prefs):
    for p in prefs:
        if n % p == 0:
            return p
    return n


# ---------------------------------------------------------------------------
# K-tiled linear (matmul + bias) kernel: out = x @ w + b
# ---------------------------------------------------------------------------
def _linear_kernel(x_ref, w_ref, b_ref, o_ref, acc_ref):
    k = pl.program_id(2)

    @pl.when(k == 0)
    def _():
        acc_ref[...] = jnp.zeros(acc_ref.shape, jnp.float32)

    acc_ref[...] += jnp.dot(x_ref[...], w_ref[...],
                            preferred_element_type=jnp.float32)

    @pl.when(k == pl.num_programs(2) - 1)
    def _():
        o_ref[...] = (acc_ref[...] + b_ref[...]).astype(o_ref.dtype)


def _linear(x2d, w, b, out_dtype=None):
    """x2d: (M, K), w: (K, N), b: (1, N) -> (M, N)."""
    M, K = x2d.shape
    _, N = w.shape
    out_dtype = out_dtype or x2d.dtype
    tm = _pick_tile(M, (256, 128))
    tn = _pick_tile(N, (256, 128))
    tk = _pick_tile(K, (512, 256, 128))

    return pl.pallas_call(
        _linear_kernel,
        out_shape=jax.ShapeDtypeStruct((M, N), out_dtype),
        grid_spec=pltpu.PrefetchScalarGridSpec(
            num_scalar_prefetch=0,
            grid=(M // tm, N // tn, K // tk),
            in_specs=[
                pl.BlockSpec((tm, tk), lambda i, j, k: (i, k)),
                pl.BlockSpec((tk, tn), lambda i, j, k: (k, j)),
                pl.BlockSpec((1, tn), lambda i, j, k: (0, j)),
            ],
            out_specs=pl.BlockSpec((tm, tn), lambda i, j, k: (i, j)),
            scratch_shapes=[pltpu.VMEM((tm, tn), jnp.float32)],
        ),
        compiler_params=pltpu.CompilerParams(
            dimension_semantics=("parallel", "parallel", "arbitrary")),
    )(x2d, w, b)


# ---------------------------------------------------------------------------
# Flash attention kernel (online softmax over KV blocks).
# qkv packed: (3, B*H, S, D) bf16; q is pre-scaled by 1/sqrt(D) (folded into Wq).
# ---------------------------------------------------------------------------
def _flash_kernel(q_ref, k_ref, v_ref, o_ref, m_sc, l_sc, acc_sc):
    ki = pl.program_id(2)

    @pl.when(ki == 0)
    def _():
        m_sc[...] = jnp.full(m_sc.shape, -jnp.inf, jnp.float32)
        l_sc[...] = jnp.zeros(l_sc.shape, jnp.float32)
        acc_sc[...] = jnp.zeros(acc_sc.shape, jnp.float32)

    q = q_ref[0, 0]                                  # (tq, D) bf16
    k = k_ref[0, 0]                                  # (tk, D) bf16
    v = v_ref[0, 0]                                  # (tk, D) bf16

    # scores = q @ k^T, contracting last dims (no explicit transpose).
    s = lax.dot_general(q, k, (((1,), (1,)), ((), ())),
                        preferred_element_type=jnp.float32)   # (tq, tk) f32

    m_prev = m_sc[...]                               # (tq, 1)
    m_new = jnp.maximum(m_prev, jnp.max(s, axis=-1, keepdims=True))
    alpha = jnp.exp(m_prev - m_new)                  # rescale factor
    p = jnp.exp(s - m_new)                           # (tq, tk)

    l_sc[...] = alpha * l_sc[...] + jnp.sum(p, axis=-1, keepdims=True)
    acc_sc[...] = alpha * acc_sc[...] + jnp.dot(
        p.astype(v.dtype), v, preferred_element_type=jnp.float32)
    m_sc[...] = m_new

    @pl.when(ki == pl.num_programs(2) - 1)
    def _():
        o_ref[0] = (acc_sc[...] * pl.reciprocal(l_sc[...], approx=True)
                    ).astype(o_ref.dtype)


def _flash_attention(qkv3, *, block_q=128, block_k=128, out_dtype=jnp.bfloat16):
    """qkv3: (3, BH, S, D) -> ctx (BH, S, D)."""
    _, BH, S, D = qkv3.shape
    tq = _pick_tile(S, (block_q,))
    tk = _pick_tile(S, (block_k,))

    return pl.pallas_call(
        _flash_kernel,
        out_shape=jax.ShapeDtypeStruct((BH, S, D), out_dtype),
        grid_spec=pltpu.PrefetchScalarGridSpec(
            num_scalar_prefetch=0,
            grid=(BH, S // tq, S // tk),
            in_specs=[
                pl.BlockSpec((1, 1, tq, D), lambda bh, qi, ki: (0, bh, qi, 0)),
                pl.BlockSpec((1, 1, tk, D), lambda bh, qi, ki: (1, bh, ki, 0)),
                pl.BlockSpec((1, 1, tk, D), lambda bh, qi, ki: (2, bh, ki, 0)),
            ],
            out_specs=pl.BlockSpec((1, tq, D), lambda bh, qi, ki: (bh, qi, 0)),
            scratch_shapes=[
                pltpu.VMEM((tq, 1), jnp.float32),    # running max
                pltpu.VMEM((tq, 1), jnp.float32),    # running denominator
                pltpu.VMEM((tq, D), jnp.float32),    # output accumulator
            ],
        ),
        compiler_params=pltpu.CompilerParams(
            dimension_semantics=("parallel", "parallel", "arbitrary")),
    )(qkv3, qkv3, qkv3)


# ---------------------------------------------------------------------------
# Full forward wrapper
# ---------------------------------------------------------------------------
def sequence_parallel_attention(x, params, *, num_heads, head_dim, sp_size=1,
                                attn_dtype=jnp.bfloat16):
    """x: (B, S, E). params: pre-transposed (in, out) weights and (1, out) biases."""
    B, S, E = x.shape
    A = num_heads * head_dim
    scale = 1.0 / math.sqrt(head_dim)

    # Fused QKV weight; fold the softmax scale into the Q projection.
    wqkv = jnp.concatenate(
        [params["wq"] * scale, params["wk"], params["wv"]], axis=1)      # (E, 3A)
    bqkv = jnp.concatenate(
        [params["bq"] * scale, params["bk"], params["bv"]], axis=1)      # (1, 3A)

    # Fused QKV projection, emitted directly in the attention dtype (bf16).
    qkv = _linear(x.reshape(B * S, E), wqkv, bqkv, out_dtype=attn_dtype)
    qkv3 = (qkv.reshape(B, S, 3, num_heads, head_dim)
               .transpose(2, 0, 3, 1, 4)
               .reshape(3, B * num_heads, S, head_dim))

    ctx = _flash_attention(qkv3, out_dtype=attn_dtype)                   # (B*H, S, D)
    ctx = ctx.reshape(B, num_heads, S, head_dim).transpose(0, 2, 1, 3)
    ctx = ctx.reshape(B * S, A)

    # Ring normalization (/sp_size) folded into the output projection weight;
    # bf16 weight so ctx @ wo takes the MXU bf16 fast path (f32 accumulation).
    wo = (params["wo"] / float(sp_size)).astype(attn_dtype)
    out = _linear(ctx, wo, params["bo"], out_dtype=x.dtype)              # (B*S, E)
    return out.reshape(B, S, E)


# ---------------------------------------------------------------------------
# Reference + test
# ---------------------------------------------------------------------------
def _xavier_uniform(key, fan_out, fan_in, dtype=jnp.float32):
    # torch.nn.init.xavier_uniform_ on a (out, in) Linear weight
    limit = math.sqrt(6.0 / (fan_in + fan_out))
    return jax.random.uniform(key, (fan_out, fan_in), dtype,
                              minval=-limit, maxval=limit)


def _reference(x, params, *, num_heads, head_dim, sp_size=1):
    """Plain-JAX f32 reference mirroring the PyTorch forward (eval mode)."""
    B, S, E = x.shape
    q = x @ params["wq"] + params["bq"]
    k = x @ params["wk"] + params["bk"]
    v = x @ params["wv"] + params["bv"]

    def to_heads(t):
        return t.reshape(B, S, num_heads, head_dim).transpose(0, 2, 1, 3)

    qh, kh, vh = to_heads(q), to_heads(k), to_heads(v)
    scores = jnp.einsum("bhqd,bhkd->bhqk", qh, kh) / math.sqrt(head_dim)
    probs = jax.nn.softmax(scores, axis=-1)
    ctx = jnp.einsum("bhqk,bhkd->bhqd", probs, vh) / float(sp_size)
    ctx = ctx.transpose(0, 2, 1, 3).reshape(B, S, num_heads * head_dim)
    return ctx @ params["wo"] + params["bo"]


if __name__ == "__main__":
    batch, seq, hidden = 2, 8, 32
    num_heads = 4
    head_dim = hidden // num_heads          # 8
    all_head = num_heads * head_dim         # 32
    sp_size = 1                             # single-device config

    key = jax.random.PRNGKey(0)
    kx, kq, kk, kv, ko = jax.random.split(key, 5)

    x = jax.random.normal(kx, (batch, seq, hidden), jnp.float32)

    # PyTorch Linear stores weight as (out, in); kernel wants (in, out).
    wq_t = _xavier_uniform(kq, all_head, hidden)
    wk_t = _xavier_uniform(kk, all_head, hidden)
    wv_t = _xavier_uniform(kv, all_head, hidden)
    wo_t = _xavier_uniform(ko, hidden, all_head)

    params = {
        "wq": wq_t.T, "bq": jnp.zeros((1, all_head), jnp.float32),
        "wk": wk_t.T, "bk": jnp.zeros((1, all_head), jnp.float32),
        "wv": wv_t.T, "bv": jnp.zeros((1, all_head), jnp.float32),
        "wo": wo_t.T, "bo": jnp.zeros((1, hidden), jnp.float32),
    }

    out = sequence_parallel_attention(
        x, params, num_heads=num_heads, head_dim=head_dim, sp_size=sp_size)
    out = jax.block_until_ready(out)

    ref = _reference(x, params, num_heads=num_heads, head_dim=head_dim,
                     sp_size=sp_size)
    assert out.shape == (batch, seq, hidden)
    max_err = float(jnp.max(jnp.abs(out - ref)))
    # bf16 attention / projection operands (f32 accumulation) -> relaxed tolerance.
    assert jnp.allclose(out, ref, atol=3e-2, rtol=3e-2), \
        f"mismatch vs reference, max abs err {max_err}"

    print("KERNEL_OK")
</pallas_src>

<mosaic_0001>
module attributes {stable_mosaic.version = 11 : i64} {
  func.func @_linear_kernel(%arg0: i32, %arg1: i32, %arg2: i32, %arg3: memref<16x32xf32, #tpu.memory_space<vmem>>, %arg4: memref<32x96xf32, #tpu.memory_space<vmem>>, %arg5: memref<1x96xf32, #tpu.memory_space<vmem>>, %arg6: memref<16x96xbf16, #tpu.memory_space<vmem>>, %arg7: memref<16x96xf32, #tpu.memory_space<vmem>>) attributes {dimension_semantics = [#tpu.dimension_semantics<parallel>, #tpu.dimension_semantics<parallel>, #tpu.dimension_semantics<arbitrary>], iteration_bounds = array<i64: 1, 1, 1>, scalar_prefetch = 0 : i64, scratch_operands = 1 : i64, tpu.core_type = #tpu.core_type<tc>, window_params = [{transform_indices = @transform_0, window_bounds = array<i64: 16, 32>}, {transform_indices = @transform_1, window_bounds = array<i64: 32, 96>}, {transform_indices = @transform_2, window_bounds = array<i64: 1, 96>}, {transform_indices = @transform_3, window_bounds = array<i64: 16, 96>}]} {
    %c0_i32 = arith.constant 0 : i32
    %0 = arith.cmpi eq, %arg2, %c0_i32 : i32
    %1 = arith.extui %0 : i1 to i32
    %c0_i32_0 = arith.constant 0 : i32
    %2 = arith.cmpi ne, %1, %c0_i32_0 : i32
    scf.if %2 {
      %cst_10 = arith.constant 0.000000e+00 : f32
      %12 = vector.broadcast %cst_10 : f32 to vector<16x96xf32>
      %c0_11 = arith.constant 0 : index
      %c0_12 = arith.constant 0 : index
      %13 = vector.load %arg7[%c0_11, %c0_12] : memref<16x96xf32, #tpu.memory_space<vmem>>, vector<16x96xf32>
      tpu.vector_store %arg7[%c0_11, %c0_12], %12 {strides = array<i32>} : memref<16x96xf32, #tpu.memory_space<vmem>>, vector<16x96xf32>,
    } else {
    }
    %c0 = arith.constant 0 : index
    %c0_1 = arith.constant 0 : index
    %3 = vector.load %arg7[%c0, %c0_1] : memref<16x96xf32, #tpu.memory_space<vmem>>, vector<16x96xf32>
    %c0_2 = arith.constant 0 : index
    %c0_3 = arith.constant 0 : index
    %4 = vector.load %arg3[%c0_2, %c0_3] : memref<16x32xf32, #tpu.memory_space<vmem>>, vector<16x32xf32>
    %c0_4 = arith.constant 0 : index
    %c0_5 = arith.constant 0 : index
    %5 = vector.load %arg4[%c0_4, %c0_5] : memref<32x96xf32, #tpu.memory_space<vmem>>, vector<32x96xf32>
    %cst = arith.constant dense<0.000000e+00> : vector<16x96xf32>
    %6 = tpu.matmul %4, %5, %cst {dimension_numbers = #tpu.dot_dimension_numbers<[1], [0], [0], [1], [0, 0, 1, 1], [], []>} : vector<16x32xf32>, vector<32x96xf32>, vector<16x96xf32> -> vector<16x96xf32>
    %7 = arith.addf %3, %6 : vector<16x96xf32>
    %c0_6 = arith.constant 0 : index
    %c0_7 = arith.constant 0 : index
    %8 = vector.load %arg7[%c0_6, %c0_7] : memref<16x96xf32, #tpu.memory_space<vmem>>, vector<16x96xf32>
    tpu.vector_store %arg7[%c0_6, %c0_7], %7 {strides = array<i32>} : memref<16x96xf32, #tpu.memory_space<vmem>>, vector<16x96xf32>,
    %c0_i32_8 = arith.constant 0 : i32
    %9 = arith.cmpi eq, %arg2, %c0_i32_8 : i32
    %10 = arith.extui %9 : i1 to i32
    %c0_i32_9 = arith.constant 0 : i32
    %11 = arith.cmpi ne, %10, %c0_i32_9 : i32
    scf.if %11 {
      %c0_10 = arith.constant 0 : index
      %c0_11 = arith.constant 0 : index
      %12 = vector.load %arg7[%c0_10, %c0_11] : memref<16x96xf32, #tpu.memory_space<vmem>>, vector<16x96xf32>
      %c0_12 = arith.constant 0 : index
      %c0_13 = arith.constant 0 : index
      %13 = vector.load %arg5[%c0_12, %c0_13] : memref<1x96xf32, #tpu.memory_space<vmem>>, vector<1x96xf32>
      %14 = vector.broadcast %13 : vector<1x96xf32> to vector<16x96xf32>
      %15 = arith.addf %12, %14 : vector<16x96xf32>
      %16 = arith.truncf %15 : vector<16x96xf32> to vector<16x96xbf16>
      %c0_14 = arith.constant 0 : index
      %c0_15 = arith.constant 0 : index
      %17 = vector.load %arg6[%c0_14, %c0_15] : memref<16x96xbf16, #tpu.memory_space<vmem>>, vector<16x96xbf16>
      tpu.vector_store %arg6[%c0_14, %c0_15], %16 {strides = array<i32>} : memref<16x96xbf16, #tpu.memory_space<vmem>>, vector<16x96xbf16>,
    } else {
    }
    return
  }
  func.func @transform_0(%arg0: i32, %arg1: i32, %arg2: i32) -> (i32, i32) {
    %c0_i32 = arith.constant 0 : i32
    return %arg0, %arg2 : i32, i32
  }
  func.func @transform_1(%arg0: i32, %arg1: i32, %arg2: i32) -> (i32, i32) {
    %c0_i32 = arith.constant 0 : i32
    return %arg2, %arg1 : i32, i32
  }
  func.func @transform_2(%arg0: i32, %arg1: i32, %arg2: i32) -> (i32, i32) {
    %c0_i32 = arith.constant 0 : i32
    %c0_i32_0 = arith.constant 0 : i32
    return %c0_i32, %arg1 : i32, i32
  }
  func.func @transform_3(%arg0: i32, %arg1: i32, %arg2: i32) -> (i32, i32) {
    %c0_i32 = arith.constant 0 : i32
    return %arg0, %arg1 : i32, i32
  }
}

</mosaic_0001>

<bundles_post_ra>
// kernel: tpu_custom_call.1
= control target key start
LH: loop header
LB: loop body
LE: loop exit
PB: predicated region body
PF: predicated region fallthrough
CT: control target
= control target key end

     0   :  { %8 = vsyncpa [#allocation4], 0  ;;  %s270_s0 = inlined_call_operand.hbm [shape: f32[16,32], index: 0, kind: input, shape index: {}]   ;;  %s271_s1 = inlined_call_operand.hbm [shape: f32[32,96], index: 1, kind: input, shape index: {}]   ;;  %s272_s2 = inlined_call_operand.vmem [shape: f32[1,96], index: 2, kind: input, shape index: {}]   ;;  %s273_s3 = inlined_call_operand.hbm [shape: bf16[16,96], index: 3, kind: output, shape index: {}]  }
   0x1   :  { %9 = vsyncpa [#allocation7], 0 }
   0x2   :  { %10 = vsyncpa [#allocation5], 0  ;;  %s15_s14 = sshll.u32 %s270_s0, 4  ;;  %s226_s15 = smov [#allocation3]   ;;  %s16_s14 = int_to_ptr.hbm [resolvable:$true] %s15_s14 }
   0x3   :  { %s17_s16 = sshll.u32 %s226_s15, 4  ;;  %s28_s19 = sshll.u32 %s271_s1, 4  ;;  %s18_s16 = int_to_ptr.vmem [resolvable:$true] %s17_s16  ;;  %s29_s19 = int_to_ptr.hbm [resolvable:$true] %s28_s19 }
   0x4   :  { %s227_s20 = smov 128   ;;  %s228_s21 = smov 8  }
   0x5   :  { %23 = dma.hbm_to_vmem [thread:$0]  %s16_s14, 256, %s18_s16, [#allocation4], %s227_s20, %s227_s20, %s228_s21  }
   0x6   :  { %s229_s22 = smov [#allocation6]  }
   0x7   :  { %s30_s23 = sshll.u32 %s229_s22, 4  ;;  %s31_s23 = int_to_ptr.vmem [resolvable:$true] %s30_s23 }
   0x8   :  { %36 = dma.hbm_to_vmem [thread:$0]  %s29_s19, 512, %s31_s23, [#allocation7], %s227_s20, %s227_s20, %s228_s21  }
   0x9   :  { %220 = dma.done.wait [#allocation4], 256  }
   0xa   :  { %221 = vsyncadd [#allocation4], 4294967040 }
   0xb   :  { %222 = dma.done.wait [#allocation7], 512  }
   0xc   :  { %223 = vsyncadd [#allocation7], 4294966784  ;;  %vm51_vm0 = vcmask 785408   ;;  %v230_v0 = vmov 0.0   ;;  %v61_v1 = vld [vmem:[#allocation6 + $0x18] sm:$0xff]  ;;  %v60_v2 = vld [vmem:[#allocation6 + $0x10] sm:$0xff] }
   0xd   :  { %52 = vst.msk [vmem:[#allocation2] sm:$0xff] %vm51_vm0, %v230_v0  ;;  %81 = vmatpush.msra.mxu0 %v61_v1  ;;  %135 = vmatpush.msra.mxu1 %v61_v1  ;;  %v59_v3 = vld [vmem:[#allocation6 + $0x8] sm:$0xff]  ;;  %v58_v4 = vld [vmem:[#allocation6] sm:$0xff]  ;;  %v56_v5 = vld [vmem:[#allocation3] sm:$0xff]  ;;  %vm62_vm1 = vcmask 261120   ;;  %s231_s24 = smov [#allocation8]  }
   0xe   :  { %53 = vst.msk [vmem:[#allocation2 + $0x8] sm:$0xff] %vm51_vm0, %v230_v0  ;;  %v57_v6 = vld [vmem:[#allocation3 + $0x8] sm:$0xff]  ;;  %v147_v13 = vld [vmem:[%s272_s2] ss:$0 sm:$0xff]  ;;  %s117_s25 = sshll.u32 %s231_s24, 4  ;;  %s119_s28 = sshll.u32 %s273_s3, 4  ;;  %s118_s25 = int_to_ptr.vmem [resolvable:$true] %s117_s25  ;;  %s120_s28 = int_to_ptr.hbm [resolvable:$true] %s119_s28 }
   0xf   :  { %82 = vmatpush.msra.mxu0 %v60_v2  ;;  %136 = vmatpush.msra.mxu1 %v60_v2  ;;  %vm110_vm2 = vcmask 781312   ;;  %s232_s29 = smov 64   ;;  %s233_s30 = smov 4  }
  0x11   :  { %83 = vmatpush.msra.mxu0 %v59_v3  ;;  %137 = vmatpush.msra.mxu1 %v59_v3 }
  0x13   :  { %84 = vmatpush.msra.mxu0 %v58_v4  ;;  %138 = vmatpush.msra.mxu1 %v58_v4 }
  0x14   :  { %133 = vmatmul.msk.f32.vlgmr.msra.gmra.mxu0 %vm62_vm1, %v56_v5  ;;  %134 = vmatmul.msk.f32.vlgmr.msra.gmra.mxu1 %vm62_vm1, %v57_v6  ;;  %v54_v7 = vld [vmem:[#allocation2] sm:$0xff] }
  0x15   :  { %v55_v8 = vld [vmem:[#allocation2 + $0x8] sm:$0xff] }
  0x91   :  { %v86_v9 = vpop.f32.mrf.mxu0  ;;  %v89_v10 = vpop.f32.mrf.mxu1 }
  0x92   :  { %v92_v11 = vadd.f32 %v86_v9, %v54_v7  ;;  %v93_v12 = vadd.f32 %v89_v10, %v55_v8 }
  0x94   :  { %95 = vst.msk [vmem:[#allocation2] sm:$0xff] %vm51_vm0, %v92_v11 }
  0x95   :  { %96 = vst.msk [vmem:[#allocation2 + $0x8] sm:$0xff] %vm51_vm0, %v93_v12 }
  0x9b   :  { %v100_v14 = vld [vmem:[#allocation2] sm:$0xff] }
  0x9c   :  { %v101_v15 = vld [vmem:[#allocation2 + $0x8] sm:$0xff]  ;;  %v106_v16 = vadd.f32 %v147_v13, %v100_v14 }
  0x9d   :  { %v107_v17 = vadd.f32 %v147_v13, %v101_v15 }
  0x9e   :  { %v108_v18 = vpack.c.bf16 %v106_v16, %v106_v16 }
  0x9f   :  { %v109_v19 = vpack.c.bf16 %v107_v17, %v107_v17 }
  0xa0   :  { %111 = vst.msk [vmem:[#allocation8] sm:$0xf] %vm110_vm2, %v108_v18 }
  0xa1   :  { %112 = vst.msk [vmem:[#allocation8 + $0x4] sm:$0xf] %vm110_vm2, %v109_v19 }
  0xa2   :  { %125 = dma.vmem_to_hbm [thread:$0]  %s118_s25, 128, %s120_s28, [#allocation5], %s232_s29, %s232_s29, %s233_s30  }
  0xa3   :  { %224 = dma.done.wait [#allocation5], 128  }
  0xa4   :  { %225 = vsyncadd [#allocation5], 4294967168 }
  0xa5   :  { %130 = vsyncpa [#allocation4], 1 }
  0xa6   :  { %131 = vsyncpa [#allocation7], 1 }
  0xa7   :  { %132 = vsyncpa [#allocation5], 1 }

</bundles_post_ra>
